<compile_context>
chip_gen: v6e
topology: v6e:2x2x1
jax: 0.10.0
libtpu: 0.0.40
codegen_flags: <defaults>
</compile_context>

<pallas_src>
import functools

import jax
import jax.numpy as jnp
from jax.experimental import pallas as pl
from jax.experimental.pallas import tpu as pltpu

LANE = 128


def mlp_kernel(x_ref, w1_ref, b_ref, w2_ref, o_ref):
    hp = w1_ref.shape[1]
    cp = w2_ref.shape[1]
    # fc1: (B, D) @ (D, Hp) + b1 -> relu  (h stays in vregs)
    h = jnp.dot(x_ref[...], w1_ref[...], preferred_element_type=jnp.float32)
    h = jnp.maximum(h + b_ref[0:1, :hp], 0.0)
    # fc2: (B, Hp) @ (Hp, Cp) + b2
    y = jnp.dot(h, w2_ref[...], preferred_element_type=jnp.float32)
    o_ref[...] = (y + b_ref[1:2, :cp]).astype(o_ref.dtype)


def _round_up(n, m):
    return ((n + m - 1) // m) * m


def prepare_padded_params(w1, b1, w2, b2):
    """Pad parameters to lane-dense shapes ONCE, off the per-call hot path.

    w1: (D, H); b1: (H,); w2: (H, C); b2: (C,)  ->  (w1p, b_packed, w2p)
    """
    D, H = w1.shape
    C = w2.shape[1]
    Hp = _round_up(H, LANE)   # 100 -> 128
    Cp = _round_up(C, LANE)   # 10  -> 128
    Lmax = max(Hp, Cp)

    w1p = jnp.pad(w1, ((0, 0), (0, Hp - H)))
    w2p = jnp.pad(w2, ((0, Hp - H), (0, Cp - C)))
    # Pack both biases into a single (2, Lmax) VMEM input (one DMA).
    b_packed = jnp.stack([
        jnp.pad(b1, (0, Lmax - H)),
        jnp.pad(b2, (0, Lmax - C)),
    ])
    return w1p, b_packed, w2p


@functools.partial(jax.jit, static_argnames="num_classes")
def neural_net_forward(x, w1p, b_packed, w2p, *, num_classes):
    """x: (B, D) f32; padded params from prepare_padded_params."""
    B, D = x.shape
    Hp = w1p.shape[1]
    Cp = w2p.shape[1]

    flops = 2 * B * (D * Hp + Hp * Cp)
    bytes_accessed = 4 * (B * D + D * Hp + b_packed.size + Hp * Cp + B * Cp)

    out_padded = pl.pallas_call(
        mlp_kernel,
        out_shape=jax.ShapeDtypeStruct((B, Cp), x.dtype),
        # No grid: single invocation, full-array VMEM-resident blocks.
        in_specs=[
            pl.BlockSpec(memory_space=pltpu.MemorySpace.VMEM),  # x (B, D)
            pl.BlockSpec(memory_space=pltpu.MemorySpace.VMEM),  # w1 (D, Hp)
            pl.BlockSpec(memory_space=pltpu.MemorySpace.VMEM),  # b (2, Lmax)
            pl.BlockSpec(memory_space=pltpu.MemorySpace.VMEM),  # w2 (Hp, Cp)
        ],
        out_specs=pl.BlockSpec(memory_space=pltpu.MemorySpace.VMEM),
        cost_estimate=pl.CostEstimate(
            flops=flops, transcendentals=0, bytes_accessed=bytes_accessed),
    )(x, w1p, b_packed, w2p)

    # Slice away padded output columns (only remaining wrapper op).
    return out_padded[:, :num_classes]


if __name__ == "__main__":
    # Module hyperparameters (synthetic, deterministic init).
    input_size = 32
    hidden = 100          # fixed by the module: nn.Linear(input_size, 100)
    num_classes = 10
    batch = 8

    key = jax.random.PRNGKey(0)
    kx, k1, k2, k3, k4 = jax.random.split(key, 5)

    x = jax.random.normal(kx, (batch, input_size), dtype=jnp.float32)

    # PyTorch nn.Linear default init: U(-1/sqrt(fan_in), 1/sqrt(fan_in))
    bound1 = 1.0 / (input_size ** 0.5)
    w1 = jax.random.uniform(k1, (input_size, hidden), jnp.float32,
                            minval=-bound1, maxval=bound1)
    b1 = jax.random.uniform(k2, (hidden,), jnp.float32,
                            minval=-bound1, maxval=bound1)
    bound2 = 1.0 / (hidden ** 0.5)
    w2 = jax.random.uniform(k3, (hidden, num_classes), jnp.float32,
                            minval=-bound2, maxval=bound2)
    b2 = jax.random.uniform(k4, (num_classes,), jnp.float32,
                            minval=-bound2, maxval=bound2)

    # Pad parameters once (outside the jitted per-call path).
    w1p, b_packed, w2p = prepare_padded_params(w1, b1, w2, b2)
    w1p, b_packed, w2p = jax.block_until_ready((w1p, b_packed, w2p))

    out = neural_net_forward(x, w1p, b_packed, w2p, num_classes=num_classes)
    out = jax.block_until_ready(out)

    # Reference check in plain JAX.
    ref = jnp.maximum(x @ w1 + b1, 0.0) @ w2 + b2
    assert out.shape == (batch, num_classes)
    assert jnp.allclose(out, ref, atol=1e-5, rtol=1e-5)

    print("KERNEL_OK")
</pallas_src>

<mosaic_0001>
module attributes {stable_mosaic.version = 11 : i64} {
  func.func @mlp_kernel(%arg0: memref<8x32xf32, #tpu.memory_space<vmem>>, %arg1: memref<32x128xf32, #tpu.memory_space<vmem>>, %arg2: memref<2x128xf32, #tpu.memory_space<vmem>>, %arg3: memref<128x128xf32, #tpu.memory_space<vmem>>, %arg4: memref<8x128xf32, #tpu.memory_space<vmem>>) attributes {dimension_semantics = [], scalar_prefetch = 0 : i64, scratch_operands = 0 : i64, tpu.core_type = #tpu.core_type<tc>} {
    %c0 = arith.constant 0 : index
    %c0_0 = arith.constant 0 : index
    %0 = vector.load %arg0[%c0, %c0_0] : memref<8x32xf32, #tpu.memory_space<vmem>>, vector<8x32xf32>
    %c0_1 = arith.constant 0 : index
    %c0_2 = arith.constant 0 : index
    %1 = vector.load %arg1[%c0_1, %c0_2] : memref<32x128xf32, #tpu.memory_space<vmem>>, vector<32x128xf32>
    %cst = arith.constant dense<0.000000e+00> : vector<8x128xf32>
    %2 = tpu.matmul %0, %1, %cst {dimension_numbers = #tpu.dot_dimension_numbers<[1], [0], [0], [1], [0, 0, 1, 1], [], []>} : vector<8x32xf32>, vector<32x128xf32>, vector<8x128xf32> -> vector<8x128xf32>
    %c0_3 = arith.constant 0 : index
    %c0_4 = arith.constant 0 : index
    %3 = vector.load %arg2[%c0_3, %c0_4] : memref<2x128xf32, #tpu.memory_space<vmem>>, vector<1x128xf32>
    %4 = vector.broadcast %3 : vector<1x128xf32> to vector<8x128xf32>
    %5 = arith.addf %2, %4 : vector<8x128xf32>
    %cst_5 = arith.constant 0.000000e+00 : f32
    %6 = vector.broadcast %cst_5 : f32 to vector<8x128xf32>
    %7 = arith.maximumf %5, %6 : vector<8x128xf32>
    %c0_6 = arith.constant 0 : index
    %c0_7 = arith.constant 0 : index
    %8 = vector.load %arg3[%c0_6, %c0_7] : memref<128x128xf32, #tpu.memory_space<vmem>>, vector<128x128xf32>
    %cst_8 = arith.constant dense<0.000000e+00> : vector<8x128xf32>
    %9 = tpu.matmul %7, %8, %cst_8 {dimension_numbers = #tpu.dot_dimension_numbers<[1], [0], [0], [1], [0, 0, 1, 1], [], []>} : vector<8x128xf32>, vector<128x128xf32>, vector<8x128xf32> -> vector<8x128xf32>
    %c1 = arith.constant 1 : index
    %c0_9 = arith.constant 0 : index
    %10 = vector.load %arg2[%c1, %c0_9] : memref<2x128xf32, #tpu.memory_space<vmem>>, vector<1x128xf32>
    %11 = vector.broadcast %10 : vector<1x128xf32> to vector<8x128xf32>
    %12 = arith.addf %9, %11 : vector<8x128xf32>
    %c0_10 = arith.constant 0 : index
    %c0_11 = arith.constant 0 : index
    %13 = vector.load %arg4[%c0_10, %c0_11] : memref<8x128xf32, #tpu.memory_space<vmem>>, vector<8x128xf32>
    tpu.vector_store %arg4[%c0_10, %c0_11], %12 {strides = array<i32>} : memref<8x128xf32, #tpu.memory_space<vmem>>, vector<8x128xf32>,
    return
  }
}

</mosaic_0001>

<bundles_post_ra>
// kernel: neural_net_forward.1
= control target key start
LH: loop header
LB: loop body
LE: loop exit
PB: predicated region body
PF: predicated region fallthrough
CT: control target
= control target key end

     0   :  { %9 = vsyncpa [#allocation3], 0  ;;  %s488_s0 = inlined_call_operand.hbm [shape: f32[8,32], index: 0, kind: input, shape index: {}]   ;;  %s489_s1 = inlined_call_operand.hbm [shape: f32[32,128], index: 1, kind: input, shape index: {}]   ;;  %s490_s2 = inlined_call_operand.vmem [shape: f32[2,128], index: 2, kind: input, shape index: {}]   ;;  %s491_s3 = inlined_call_operand.hbm [shape: f32[128,128], index: 3, kind: input, shape index: {}]   ;;  %s492_s4 = inlined_call_operand.hbm [shape: f32[8,128], index: 4, kind: output, shape index: {}]  }
   0x1   :  { %10 = vsyncpa [#allocation6], 0 }
   0x2   :  { %11 = vsyncpa [#allocation4], 0  ;;  %s415_s15 = smov [#allocation5]  }
   0x3   :  { %s27_s16 = sshll.u32 %s415_s15, 4  ;;  %s28_s16 = int_to_ptr.vmem [resolvable:$true] %s27_s16 }
   0x4   :  { %s337_s17 = scalar_lea.vmem %s28_s16, 512  ;;  %p342_p1 = scmp.lt.s32.totalorder %s28_s16, %s28_s16 }
   0x5   :  { %p338_p0 = scmp.ne.s32.totalorder %s28_s16, %s337_s17  ;;  %p343_p2 = scmp.lt.s32.totalorder %s337_s17, %s337_s17 }
   0x7   :  { %p344_p3 = por %p343_p2, %p342_p1 }
   0x9   :  { %p345_p4 = pnand %p344_p3, %p338_p0 }
   0xb   :  { %348 = shalt.err (!%p345_p4)
}
   0xc   :  { %s416_s18 = smov 128   ;;  %s417_s19 = smov 8  }
   0xd   :  { %33 = dma.hbm_to_vmem [thread:$0]  %s489_s1, 512, %s28_s16, [#allocation6], %s416_s18, %s416_s18, %s417_s19  }
   0xe   :  { %s418_s22 = smov [#allocation2]   ;;  %s419_s24 = smov [#allocation7]  }
   0xf   :  { %s18_s23 = sshll.u32 %s418_s22, 4  ;;  %s41_s25 = sshll.u32 %s419_s24, 4  ;;  %s19_s23 = int_to_ptr.vmem [resolvable:$true] %s18_s23  ;;  %s42_s25 = int_to_ptr.vmem [resolvable:$true] %s41_s25 }
  0x10   :  { %s357_s26 = scalar_lea.vmem %s19_s23, 128  ;;  %p362_p6 = scmp.lt.s32.totalorder %s19_s23, %s19_s23 }
  0x11   :  { %p358_p5 = scmp.ne.s32.totalorder %s19_s23, %s357_s26  ;;  %p363_p7 = scmp.lt.s32.totalorder %s357_s26, %s357_s26 }
  0x13   :  { %p364_p8 = por %p363_p7, %p362_p6 }
  0x15   :  { %p365_p9 = pnand %p364_p8, %p358_p5 }
  0x17   :  { %368 = shalt.err (!%p365_p9)
}
  0x18   :  { %21 = dma.hbm_to_vmem [thread:$0]  %s488_s0, 128, %s19_s23, [#allocation3]  }
  0x19   :  { %s377_s29 = scalar_lea.vmem %s42_s25, 2048  ;;  %p382_p11 = scmp.lt.s32.totalorder %s42_s25, %s42_s25 }
  0x1a   :  { %p378_p10 = scmp.ne.s32.totalorder %s42_s25, %s377_s29  ;;  %p383_p12 = scmp.lt.s32.totalorder %s377_s29, %s377_s29 }
  0x1c   :  { %p384_p13 = por %p383_p12, %p382_p11 }
  0x1e   :  { %p385_p0 = pnand %p384_p13, %p378_p10 }
  0x20   :  { %388 = shalt.err (!%p385_p0)
}
  0x21   :  { %47 = dma.hbm_to_vmem [thread:$0]  %s491_s3, 2048, %s42_s25, [#allocation6], %s416_s18, %s416_s18, %s417_s19  }
  0x22   :  { %409 = dma.done.wait [#allocation3], 128  }
  0x23   :  { %410 = vsyncadd [#allocation3], 4294967168 }
  0x24   :  { %411 = dma.done.wait [#allocation6], 2560  }
  0x25   :  { %412 = vsyncadd [#allocation6], 4294964736  ;;  %v420_v0 = vmov 0.0   ;;  %vm421_vm0 = vmmov 0   ;;  %v61_v1 = vld [vmem:[#allocation5 + $0x18] sm:$0xff]  ;;  %v60_v2 = vld [vmem:[#allocation5 + $0x10] sm:$0xff] }
  0x26   :  { %275 = vmatprep.subr.mxu0 %v420_v0  ;;  %283 = vmatprep.mubr.msk.f32.mxu0 %vm421_vm0, %v420_v0  ;;  %v157_v3 = vld [vmem:[#allocation7 + $0x78] sm:$0xff]  ;;  %v59_v4 = vld [vmem:[#allocation5 + $0x8] sm:$0xff]  ;;  %v156_v5 = vld [vmem:[#allocation7 + $0x70] sm:$0xff]  ;;  %vm67_vm1 = vcmask 261120   ;;  %s422_s7 = smov [#allocation8]  }
  0x27   :  { %286 = vmatprep.subr.mxu1 %v420_v0  ;;  %318 = vmatprep.mubr.msk.f32.mxu1 %vm421_vm0, %v420_v0  ;;  %v155_v6 = vld [vmem:[#allocation7 + $0x68] sm:$0xff]  ;;  %v58_v7 = vld [vmem:[#allocation5] sm:$0xff]  ;;  %v57_v8 = vld [vmem:[#allocation2] sm:$0xff]  ;;  %s240_s8 = sshll.u32 %s422_s7, 4  ;;  %s241_s8 = int_to_ptr.vmem [resolvable:$true] %s240_s8 }
  0x28   :  { %276 = vmatpush3.msra.mxu0 %v61_v1  ;;  %287 = vmatpush3.msra.mxu1 %v157_v3  ;;  %v154_v9 = vld [vmem:[#allocation7 + $0x60] sm:$0xff]  ;;  %v153_v10 = vld [vmem:[#allocation7 + $0x58] sm:$0xff]  ;;  %v152_v11 = vld [vmem:[#allocation7 + $0x50] sm:$0xff]  ;;  %s389_s9 = scalar_lea.vmem %s241_s8, 128  ;;  %p394_p2 = scmp.lt.s32.totalorder %s241_s8, %s241_s8 }
  0x29   :  { %277 = vmatprep.subr.mxu0 %v420_v0  ;;  %288 = vmatprep.subr.mxu1 %v420_v0  ;;  %v151_v12 = vld [vmem:[#allocation7 + $0x48] sm:$0xff]  ;;  %v150_v13 = vld [vmem:[#allocation7 + $0x40] sm:$0xff]  ;;  %v149_v14 = vld [vmem:[#allocation7 + $0x38] sm:$0xff]  ;;  %p390_p1 = scmp.ne.s32.totalorder %s241_s8, %s389_s9  ;;  %p395_p3 = scmp.lt.s32.totalorder %s389_s9, %s389_s9 }
  0x2a   :  { %278 = vmatpush3.msra.mxu0 %v60_v2  ;;  %289 = vmatpush3.msra.mxu1 %v156_v5  ;;  %v148_v15 = vld [vmem:[#allocation7 + $0x30] sm:$0xff]  ;;  %v147_v16 = vld [vmem:[#allocation7 + $0x28] sm:$0xff]  ;;  %v146_v17 = vld [vmem:[#allocation7 + $0x20] sm:$0xff] }
  0x2b   :  { %279 = vmatprep.subr.mxu0 %v420_v0  ;;  %290 = vmatprep.subr.mxu1 %v420_v0  ;;  %v145_v18 = vld [vmem:[#allocation7 + $0x18] sm:$0xff]  ;;  %v144_v19 = vld [vmem:[#allocation7 + $0x10] sm:$0xff]  ;;  %v143_v20 = vld [vmem:[#allocation7 + $0x8] sm:$0xff]  ;;  %p396_p4 = por %p395_p3, %p394_p2 }
  0x2c   :  { %280 = vmatpush3.msra.mxu0 %v59_v4  ;;  %291 = vmatpush3.msra.mxu1 %v155_v6  ;;  %v142_v21 = vld [vmem:[#allocation7] sm:$0xff]  ;;  %v250_v22 = vld [vmem:[%s490_s2] ss:$0 sm:$0xff]  ;;  %v252_v27 = vld [vmem:[%s490_s2 + $0x1] ss:$0 sm:$0xff] }
  0x2d   :  { %281 = vmatprep.subr.mxu0 %v420_v0  ;;  %292 = vmatprep.subr.mxu1 %v420_v0  ;;  %p397_p5 = pnand %p396_p4, %p390_p1 }
  0x2e   :  { %282 = vmatpush3.msra.mxu0 %v58_v7  ;;  %293 = vmatpush3.msra.mxu1 %v154_v9 }
  0x2f   :  { %284 = vmatmul.mubr.msk.f32.vlgmr.msra.gmra.mxu0 %vm67_vm1, %v57_v8  ;;  %294 = vmatprep.subr.mxu1 %v420_v0 }
  0x30   :  { %295 = vmatpush3.msra.mxu1 %v153_v10 }
  0x31   :  { %296 = vmatprep.subr.mxu1 %v420_v0 }
  0x32   :  { %297 = vmatpush3.msra.mxu1 %v152_v11 }
  0x33   :  { %298 = vmatprep.subr.mxu1 %v420_v0 }
  0x34   :  { %299 = vmatpush3.msra.mxu1 %v151_v12 }
  0x35   :  { %300 = vmatprep.subr.mxu1 %v420_v0 }
  0x36   :  { %301 = vmatpush3.msra.mxu1 %v150_v13 }
  0x37   :  { %302 = vmatprep.subr.mxu1 %v420_v0 }
  0x38   :  { %303 = vmatpush3.msra.mxu1 %v149_v14 }
  0x39   :  { %304 = vmatprep.subr.mxu1 %v420_v0 }
  0x3a   :  { %305 = vmatpush3.msra.mxu1 %v148_v15 }
  0x3b   :  { %306 = vmatprep.subr.mxu1 %v420_v0 }
  0x3c   :  { %307 = vmatpush3.msra.mxu1 %v147_v16 }
  0x3d   :  { %308 = vmatprep.subr.mxu1 %v420_v0 }
  0x3e   :  { %309 = vmatpush3.msra.mxu1 %v146_v17 }
  0x3f   :  { %310 = vmatprep.subr.mxu1 %v420_v0 }
  0x40   :  { %311 = vmatpush3.msra.mxu1 %v145_v18 }
  0x41   :  { %312 = vmatprep.subr.mxu1 %v420_v0 }
  0x42   :  { %313 = vmatpush3.msra.mxu1 %v144_v19 }
  0x43   :  { %314 = vmatprep.subr.mxu1 %v420_v0 }
  0x44   :  { %315 = vmatpush3.msra.mxu1 %v143_v20 }
  0x45   :  { %316 = vmatprep.subr.mxu1 %v420_v0 }
  0x46   :  { %317 = vmatpush3.msra.mxu1 %v142_v21 }
  0xef   :  { %v137_v23 = vpop.f32.mrf.mxu0 }
  0xf0   :  { %v138_v24 = vadd.f32 %v250_v22, %v137_v23 }
  0xf1   :  { %v285_v25 = vpop.f32.mrf.mxu0 }
  0xf2   :  { %v141_v26 = vmax.f32 %v138_v24, 0.0 }
  0xf4   :  { %319 = vmatmul.mubr.f32.vlgmr.msra.gmra.mxu1 %v141_v26 }
 0x1b4   :  { %v229_v28 = vpop.f32.mrf.mxu1 }
 0x1b5   :  { %v230_v29 = vadd.f32 %v252_v27, %v229_v28 }
 0x1b6   :  { %v320_v30 = vpop.f32.mrf.mxu1 }
 0x1b7   :  { %233 = vst [vmem:[#allocation8] sm:$0xff] %v230_v29 }
 0x1b8   :  { %400 = shalt.err (!%p397_p5)
}
 0x1b9   :  { %243 = dma.vmem_to_hbm [thread:$0]  %s241_s8, 128, %s492_s4, [#allocation4]  }
 0x1ba   :  { %413 = dma.done.wait [#allocation4], 128  }
 0x1bb   :  { %414 = vsyncadd [#allocation4], 4294967168 }
 0x1bc   :  { %247 = vsyncpa [#allocation3], 1 }
 0x1bd   :  { %248 = vsyncpa [#allocation6], 1 }
 0x1be   :  { %249 = vsyncpa [#allocation4], 1 }

</bundles_post_ra>
